<compile_context>
chip_gen: v5e
topology: v5e:2x2
jax: 0.10.0
libtpu: 0.0.40
codegen_flags: <defaults>
</compile_context>

<pallas_src>
import functools
from typing import NamedTuple, Optional

import jax
import jax.numpy as jnp
from jax import lax
from jax.experimental import pallas as pl
from jax.experimental.pallas import tpu as pltpu


_LANE = 128
_NI_TILE_CAP = 2048  # cap on the num_item tile (encoder-K chunk and decoder-N chunk)


def _round_up(n: int, m: int) -> int:
    return (n + m - 1) // m * m


def _pick_ni_tile(ni_padded: int, cap: int = _NI_TILE_CAP) -> int:
    """Tile along the (128-padded) num_item axis: multiple of 128, ~<= cap."""
    if ni_padded <= cap:
        return ni_padded
    n_tiles = -(-ni_padded // cap)
    return _round_up(-(-ni_padded // n_tiles), _LANE)


def _vmem_capacity_bytes() -> int:
    try:
        return int(pltpu.get_tpu_info().vmem_capacity_bytes)
    except Exception:
        return 64 << 20  # conservative: v7x per-TensorCore VMEM


def _default_tm() -> int:
    try:
        kind = jax.devices()[0].device_kind.lower()
        if "v5" in kind:  # v5e MXU is 128-wide; 256 fills v6e/v7x
            return 128
    except Exception:
        pass
    return 256


def _pick_tm(batch: int, tm: int, min_tile: int) -> int:
    """Shrink TM so there are >= 2 batch tiles (pipelining / megacore split)."""
    tm = max(min_tile, _round_up(tm, min_tile))
    while tm > min_tile and _round_up(batch, tm) // tm < 2:
        tm = max(min_tile, _round_up(tm // 2, min_tile))
    return tm


class VAEParams(NamedTuple):
    w1: jax.Array   # (ni_p, h_p)  encoder mu-half weight, laid out (in, out)
    b1: jax.Array   # (1, h_p)     f32
    w2: jax.Array   # (h_p, ni_p)  decoder weight, laid out (in, out)
    b2: jax.Array   # (1, ni_p)    f32
    num_item: int
    hidden: int
    ni_tile: int
    mxu_dtype: jnp.dtype


def prepare_vae_params(w_enc_t, b_enc, w_dec_t, b_dec, *, hidden: int,
                       mxu_dtype=jnp.bfloat16) -> VAEParams:
    """Pad / cast the weights once; reuse the result across forward calls."""
    num_item = w_enc_t.shape[0]
    assert w_enc_t.shape == (num_item, 2 * hidden)
    assert w_dec_t.shape == (hidden, num_item)

    ni_p0 = _round_up(num_item, _LANE)
    ni_tile = _pick_ni_tile(ni_p0)
    ni_p = _round_up(ni_p0, ni_tile)
    h_p = _round_up(hidden, _LANE)

    # Only the mu half of the encoder is ever read in eval mode.
    w_enc_mu = w_enc_t[:, :hidden]
    b_enc_mu = jnp.reshape(b_enc, (1, -1))[:, :hidden]
    b_dec2 = jnp.reshape(b_dec, (1, -1))

    w1 = jnp.zeros((ni_p, h_p), mxu_dtype).at[:num_item, :hidden].set(
        w_enc_mu.astype(mxu_dtype))
    b1 = jnp.zeros((1, h_p), jnp.float32).at[:, :hidden].set(
        b_enc_mu.astype(jnp.float32))
    w2 = jnp.zeros((h_p, ni_p), mxu_dtype).at[:hidden, :num_item].set(
        w_dec_t.astype(mxu_dtype))
    b2 = jnp.zeros((1, ni_p), jnp.float32).at[:, :num_item].set(
        b_dec2.astype(jnp.float32))

    return VAEParams(w1=w1, b1=b1, w2=w2, b2=b2, num_item=num_item,
                     hidden=hidden, ni_tile=ni_tile,
                     mxu_dtype=jnp.dtype(mxu_dtype))


def _encoder_kernel(x_ref, w1_ref, b1_ref, mu_ref, acc_ref, ss_ref, *, precision):
    """mu = (x @ W1) * rsqrt(sum(x^2)) + b1, K-reduced over num_item chunks."""
    k = pl.program_id(1)

    @pl.when(k == 0)
    def _():
        acc_ref[...] = jnp.zeros_like(acc_ref)
        ss_ref[...] = jnp.zeros_like(ss_ref)

    x = x_ref[...]
    xf = x.astype(jnp.float32)
    # Row-wise sum of squares accumulates alongside the matmul; F.normalize's
    # L2 scaling is applied as a per-row scalar after the K reduction.
    ss_ref[...] += jnp.sum(xf * xf, axis=1, keepdims=True)
    acc_ref[...] += jnp.dot(x, w1_ref[...], preferred_element_type=jnp.float32,
                            precision=precision)

    @pl.when(k == pl.num_programs(1) - 1)
    def _():
        # 1/max(||x||, 1e-12) == rsqrt(max(sum x^2, 1e-24)); rsqrt uses the EUP.
        inv = lax.rsqrt(jnp.maximum(ss_ref[...], 1e-24))
        mu = acc_ref[...] * inv + b1_ref[...]
        mu_ref[...] = mu.astype(mu_ref.dtype)


def _decoder_kernel(mu_ref, w2_ref, b2_ref, out_ref, *, precision):
    """out[:, j-block] = mu @ W2[:, j-block] + b2[j-block]."""
    out = jnp.dot(mu_ref[...], w2_ref[...], preferred_element_type=jnp.float32,
                  precision=precision) + b2_ref[...]
    out_ref[...] = out.astype(out_ref.dtype)


def vae_forward(x, params: VAEParams, *, tm: Optional[int] = None,
                out_dtype=jnp.float32):
    """Eval-mode VAE forward: x (B, num_item) -> (B, num_item)."""
    B, num_item = x.shape
    assert num_item == params.num_item
    mxu_dtype = params.mxu_dtype
    precision = lax.Precision.HIGHEST if mxu_dtype == jnp.float32 else None

    ni_p, h_p = params.w1.shape
    tn = params.ni_tile
    k_tiles = ni_p // tn
    n_tiles = k_tiles

    # Stream x and the mu intermediate in the MXU dtype (bf16 fast path).
    stream_dtype = mxu_dtype
    x_itemsize = jnp.dtype(stream_dtype).itemsize
    min_tile = 16 if x_itemsize < 4 else 8
    tm = _pick_tm(B, _default_tm() if tm is None else tm, min_tile)
    b_p = _round_up(B, tm)
    b_tiles = b_p // tm

    x_p = jnp.zeros((b_p, ni_p), stream_dtype).at[:B, :num_item].set(
        x.astype(stream_dtype))

    w_itemsize = jnp.dtype(mxu_dtype).itemsize
    vmem_cap = int(0.85 * _vmem_capacity_bytes())

    # ---------------- encoder: mu = normalize(x) @ W1 + b1 ----------------
    enc_vmem = (
        2 * tm * tn * x_itemsize        # x chunk (double-buffered)
        + 2 * tn * h_p * w_itemsize     # w1 chunk
        + 2 * h_p * 4                   # b1
        + 2 * tm * h_p * w_itemsize     # mu output tile
        + tm * h_p * 4 + tm * 128 * 4   # f32 scratch (acc, lane-padded sumsq)
        + 2 * tm * tn * 4               # in-kernel f32 temporaries (xf, squares)
        + (4 << 20)                     # headroom
    )
    enc_cost = pl.CostEstimate(
        flops=2 * b_p * ni_p * h_p,
        transcendentals=b_p,
        bytes_accessed=int(
            x_p.size * x_itemsize
            + params.w1.size * w_itemsize * (b_tiles if k_tiles > 1 else 1)
            + b_p * h_p * w_itemsize + params.b1.size * 4),
    )
    mu = pl.pallas_call(
        functools.partial(_encoder_kernel, precision=precision),
        out_shape=jax.ShapeDtypeStruct((b_p, h_p), mxu_dtype),
        grid_spec=pltpu.PrefetchScalarGridSpec(
            num_scalar_prefetch=0,
            grid=(b_tiles, k_tiles),
            in_specs=[
                pl.BlockSpec((tm, tn), lambda i, k: (i, k)),   # x chunk
                pl.BlockSpec((tn, h_p), lambda i, k: (k, 0)),  # w1 chunk
                pl.BlockSpec((1, h_p), lambda i, k: (0, 0)),   # b1 (constant)
            ],
            out_specs=pl.BlockSpec((tm, h_p), lambda i, k: (i, 0)),
            scratch_shapes=[pltpu.VMEM((tm, h_p), jnp.float32),
                            pltpu.VMEM((tm, 1), jnp.float32)],
        ),
        compiler_params=pltpu.CompilerParams(
            dimension_semantics=("parallel", "arbitrary"),
            vmem_limit_bytes=int(min(max(enc_vmem, 16 << 20), vmem_cap)),
        ),
        cost_estimate=enc_cost,
    )(x_p, params.w1, params.b1)

    # ---------------- decoder: out = mu @ W2 + b2 ----------------
    out_itemsize = jnp.dtype(out_dtype).itemsize
    dec_vmem = (
        2 * tm * h_p * w_itemsize       # mu tile
        + 2 * h_p * tn * w_itemsize     # w2 column block
        + 2 * tn * 4                    # b2 block
        + 2 * tm * tn * out_itemsize    # out tile
        + tm * tn * 4                   # f32 temporary before the final cast
        + (4 << 20)
    )
    dec_cost = pl.CostEstimate(
        flops=2 * b_p * h_p * ni_p,
        transcendentals=0,
        bytes_accessed=int(
            b_p * h_p * w_itemsize
            + params.w2.size * w_itemsize * (b_tiles if n_tiles > 1 else 1)
            + params.b2.size * 4 + b_p * ni_p * out_itemsize),
    )
    out_p = pl.pallas_call(
        functools.partial(_decoder_kernel, precision=precision),
        out_shape=jax.ShapeDtypeStruct((b_p, ni_p), out_dtype),
        grid_spec=pltpu.PrefetchScalarGridSpec(
            num_scalar_prefetch=0,
            grid=(b_tiles, n_tiles),
            in_specs=[
                pl.BlockSpec((tm, h_p), lambda i, j: (i, 0)),  # mu (constant over j)
                pl.BlockSpec((h_p, tn), lambda i, j: (0, j)),  # w2 column block
                pl.BlockSpec((1, tn), lambda i, j: (0, j)),    # b2 block
            ],
            out_specs=pl.BlockSpec((tm, tn), lambda i, j: (i, j)),
        ),
        compiler_params=pltpu.CompilerParams(
            dimension_semantics=("parallel", "parallel"),
            vmem_limit_bytes=int(min(max(dec_vmem, 16 << 20), vmem_cap)),
        ),
        cost_estimate=dec_cost,
    )(mu, params.w2, params.b2)

    return out_p[:B, :num_item]


def vae_forward_ref(x, w_enc_t, b_enc, w_dec_t, b_dec, *, hidden: int):
    norm = jnp.sqrt(jnp.sum(x * x, axis=1, keepdims=True))
    xn = x / jnp.maximum(norm, 1e-12)
    h = jnp.dot(xn, w_enc_t, precision=lax.Precision.HIGHEST) + jnp.reshape(b_enc, (1, -1))
    mu = h[:, :hidden]
    return jnp.dot(mu, w_dec_t, precision=lax.Precision.HIGHEST) + jnp.reshape(b_dec, (1, -1))


if __name__ == "__main__":
    # Small synthetic config consistent with the module:
    #   num_item = 256, hidden = 128, batch of 8 users.
    num_item, hidden, batch = 256, 128, 8

    key = jax.random.PRNGKey(0)
    k_x, k_w1, k_b1, k_w2, k_b2 = jax.random.split(key, 5)

    # Sparse-ish binary interaction rows (like rows of train_matrix).
    x = (jax.random.uniform(k_x, (batch, num_item)) < 0.1).astype(jnp.float32)
    # Encoder Linear(num_item, 2*hidden), stored pre-transposed (in, out).
    w_enc_t = jax.random.normal(k_w1, (num_item, 2 * hidden), jnp.float32) * 0.02
    b_enc = jax.random.normal(k_b1, (1, 2 * hidden), jnp.float32) * 0.01
    # Decoder Linear(hidden, num_item).
    w_dec_t = jax.random.normal(k_w2, (hidden, num_item), jnp.float32) * 0.02
    b_dec = jax.random.normal(k_b2, (1, num_item), jnp.float32) * 0.01

    ref = vae_forward_ref(x, w_enc_t, b_enc, w_dec_t, b_dec, hidden=hidden)

    # 1) f32 MXU path (HIGHEST precision): tight check against the reference.
    p_f32 = prepare_vae_params(w_enc_t, b_enc, w_dec_t, b_dec,
                               hidden=hidden, mxu_dtype=jnp.float32)
    out_f32 = jax.block_until_ready(vae_forward(x, p_f32))
    assert out_f32.shape == (batch, num_item)
    assert jnp.allclose(out_f32, ref, atol=1e-5, rtol=1e-5), "f32 mismatch vs reference"

    # 2) bf16 streaming / MXU path (default fast path): loose check.
    p_bf16 = prepare_vae_params(w_enc_t, b_enc, w_dec_t, b_dec,
                                hidden=hidden, mxu_dtype=jnp.bfloat16)
    out_bf16 = jax.block_until_ready(vae_forward(x, p_bf16))
    assert out_bf16.shape == (batch, num_item)
    assert jnp.allclose(out_bf16, ref, atol=2e-2, rtol=2e-2), "bf16 mismatch vs reference"

    # 3) Non-128-aligned shapes + multi-tile num_item axis (exercises padding,
    #    the encoder K-reduction and the decoder column tiling).
    ni2, h2, b2n = 2200, 96, 5
    x2 = (jax.random.uniform(k_x, (b2n, ni2)) < 0.1).astype(jnp.float32)
    w1_2 = jax.random.normal(k_w1, (ni2, 2 * h2), jnp.float32) * 0.02
    b1_2 = jax.random.normal(k_b1, (1, 2 * h2), jnp.float32) * 0.01
    w2_2 = jax.random.normal(k_w2, (h2, ni2), jnp.float32) * 0.02
    b2_2 = jax.random.normal(k_b2, (1, ni2), jnp.float32) * 0.01
    p2 = prepare_vae_params(w1_2, b1_2, w2_2, b2_2, hidden=h2, mxu_dtype=jnp.float32)
    out2 = jax.block_until_ready(vae_forward(x2, p2))
    ref2 = vae_forward_ref(x2, w1_2, b1_2, w2_2, b2_2, hidden=h2)
    assert out2.shape == (b2n, ni2)
    assert jnp.allclose(out2, ref2, atol=1e-5, rtol=1e-5), "tiled-config mismatch"

    print("KERNEL_OK")
</pallas_src>

<mosaic_0001>
module attributes {stable_mosaic.version = 11 : i64} {
  func.func @_encoder_kernel(%arg0: i32, %arg1: i32, %arg2: memref<8x256xf32, #tpu.memory_space<vmem>>, %arg3: memref<256x128xf32, #tpu.memory_space<vmem>>, %arg4: memref<1x128xf32, #tpu.memory_space<vmem>>, %arg5: memref<8x128xf32, #tpu.memory_space<vmem>>, %arg6: memref<8x128xf32, #tpu.memory_space<vmem>>, %arg7: memref<8x1xf32, #tpu.memory_space<vmem>>) attributes {dimension_semantics = [#tpu.dimension_semantics<parallel>, #tpu.dimension_semantics<arbitrary>], iteration_bounds = array<i64: 1, 1>, scalar_prefetch = 0 : i64, scratch_operands = 2 : i64, tpu.core_type = #tpu.core_type<tc>, window_params = [{transform_indices = @transform_0, window_bounds = array<i64: 8, 256>}, {transform_indices = @transform_1, window_bounds = array<i64: 256, 128>}, {pipeline_mode = #tpu.pipeline_mode<synchronous>, transform_indices = @transform_2, window_bounds = array<i64: 1, 128>}, {transform_indices = @transform_3, window_bounds = array<i64: 8, 128>}]} {
    %c0_i32 = arith.constant 0 : i32
    %0 = arith.cmpi eq, %arg1, %c0_i32 : i32
    %1 = arith.extui %0 : i1 to i32
    %c0_i32_0 = arith.constant 0 : i32
    %2 = arith.cmpi ne, %1, %c0_i32_0 : i32
    scf.if %2 {
      %cst_15 = arith.constant 0.000000e+00 : f32
      %18 = vector.broadcast %cst_15 : f32 to vector<8x128xf32>
      %c0_16 = arith.constant 0 : index
      %c0_17 = arith.constant 0 : index
      %19 = vector.load %arg6[%c0_16, %c0_17] : memref<8x128xf32, #tpu.memory_space<vmem>>, vector<8x128xf32>
      tpu.vector_store %arg6[%c0_16, %c0_17], %18 {strides = array<i32>} : memref<8x128xf32, #tpu.memory_space<vmem>>, vector<8x128xf32>,
      %cst_18 = arith.constant 0.000000e+00 : f32
      %20 = vector.broadcast %cst_18 : f32 to vector<8x1xf32>
      %c0_19 = arith.constant 0 : index
      %c0_20 = arith.constant 0 : index
      %21 = vector.load %arg7[%c0_19, %c0_20] : memref<8x1xf32, #tpu.memory_space<vmem>>, vector<8x1xf32>
      tpu.vector_store %arg7[%c0_19, %c0_20], %20 {strides = array<i32>} : memref<8x1xf32, #tpu.memory_space<vmem>>, vector<8x1xf32>,
    } else {
    }
    %c0 = arith.constant 0 : index
    %c0_1 = arith.constant 0 : index
    %3 = vector.load %arg2[%c0, %c0_1] : memref<8x256xf32, #tpu.memory_space<vmem>>, vector<8x256xf32>
    %c0_2 = arith.constant 0 : index
    %c0_3 = arith.constant 0 : index
    %4 = vector.load %arg7[%c0_2, %c0_3] : memref<8x1xf32, #tpu.memory_space<vmem>>, vector<8x1xf32>
    %5 = arith.mulf %3, %3 : vector<8x256xf32>
    %cst = arith.constant dense<0.000000e+00> : vector<8xf32>
    %6 = vector.multi_reduction <add>, %5, %cst [1] : vector<8x256xf32> to vector<8xf32>
    %7 = vector.shape_cast %6 : vector<8xf32> to vector<8x1xf32>
    %8 = arith.addf %4, %7 : vector<8x1xf32>
    %c0_4 = arith.constant 0 : index
    %c0_5 = arith.constant 0 : index
    %9 = vector.load %arg7[%c0_4, %c0_5] : memref<8x1xf32, #tpu.memory_space<vmem>>, vector<8x1xf32>
    tpu.vector_store %arg7[%c0_4, %c0_5], %8 {strides = array<i32>} : memref<8x1xf32, #tpu.memory_space<vmem>>, vector<8x1xf32>,
    %c0_6 = arith.constant 0 : index
    %c0_7 = arith.constant 0 : index
    %10 = vector.load %arg6[%c0_6, %c0_7] : memref<8x128xf32, #tpu.memory_space<vmem>>, vector<8x128xf32>
    %c0_8 = arith.constant 0 : index
    %c0_9 = arith.constant 0 : index
    %11 = vector.load %arg3[%c0_8, %c0_9] : memref<256x128xf32, #tpu.memory_space<vmem>>, vector<256x128xf32>
    %cst_10 = arith.constant dense<0.000000e+00> : vector<8x128xf32>
    %12 = tpu.matmul %3, %11, %cst_10 {dimension_numbers = #tpu.dot_dimension_numbers<[1], [0], [0], [1], [0, 0, 1, 1], [], []>, precision = #tpu.contract_precision<fp32>} : vector<8x256xf32>, vector<256x128xf32>, vector<8x128xf32> -> vector<8x128xf32>
    %13 = arith.addf %10, %12 : vector<8x128xf32>
    %c0_11 = arith.constant 0 : index
    %c0_12 = arith.constant 0 : index
    %14 = vector.load %arg6[%c0_11, %c0_12] : memref<8x128xf32, #tpu.memory_space<vmem>>, vector<8x128xf32>
    tpu.vector_store %arg6[%c0_11, %c0_12], %13 {strides = array<i32>} : memref<8x128xf32, #tpu.memory_space<vmem>>, vector<8x128xf32>,
    %c0_i32_13 = arith.constant 0 : i32
    %15 = arith.cmpi eq, %arg1, %c0_i32_13 : i32
    %16 = arith.extui %15 : i1 to i32
    %c0_i32_14 = arith.constant 0 : i32
    %17 = arith.cmpi ne, %16, %c0_i32_14 : i32
    scf.if %17 {
      %c0_15 = arith.constant 0 : index
      %c0_16 = arith.constant 0 : index
      %18 = vector.load %arg7[%c0_15, %c0_16] : memref<8x1xf32, #tpu.memory_space<vmem>>, vector<8x1xf32>
      %cst_17 = arith.constant 1.000000e-24 : f32
      %19 = vector.broadcast %cst_17 : f32 to vector<8x1xf32>
      %20 = arith.maximumf %18, %19 : vector<8x1xf32>
      %21 = math.rsqrt %20 : vector<8x1xf32>
      %c0_18 = arith.constant 0 : index
      %c0_19 = arith.constant 0 : index
      %22 = vector.load %arg6[%c0_18, %c0_19] : memref<8x128xf32, #tpu.memory_space<vmem>>, vector<8x128xf32>
      %23 = vector.broadcast %21 : vector<8x1xf32> to vector<8x128xf32>
      %24 = arith.mulf %22, %23 : vector<8x128xf32>
      %c0_20 = arith.constant 0 : index
      %c0_21 = arith.constant 0 : index
      %25 = vector.load %arg4[%c0_20, %c0_21] : memref<1x128xf32, #tpu.memory_space<vmem>>, vector<1x128xf32>
      %26 = vector.broadcast %25 : vector<1x128xf32> to vector<8x128xf32>
      %27 = arith.addf %24, %26 : vector<8x128xf32>
      %c0_22 = arith.constant 0 : index
      %c0_23 = arith.constant 0 : index
      %28 = vector.load %arg5[%c0_22, %c0_23] : memref<8x128xf32, #tpu.memory_space<vmem>>, vector<8x128xf32>
      tpu.vector_store %arg5[%c0_22, %c0_23], %27 {strides = array<i32>} : memref<8x128xf32, #tpu.memory_space<vmem>>, vector<8x128xf32>,
    } else {
    }
    return
  }
  func.func @transform_0(%arg0: i32, %arg1: i32) -> (i32, i32) {
    %c0_i32 = arith.constant 0 : i32
    return %arg0, %arg1 : i32, i32
  }
  func.func @transform_1(%arg0: i32, %arg1: i32) -> (i32, i32) {
    %c0_i32 = arith.constant 0 : i32
    %c0_i32_0 = arith.constant 0 : i32
    return %arg1, %c0_i32 : i32, i32
  }
  func.func @transform_2(%arg0: i32, %arg1: i32) -> (i32, i32) {
    %c0_i32 = arith.constant 0 : i32
    %c0_i32_0 = arith.constant 0 : i32
    %c0_i32_1 = arith.constant 0 : i32
    return %c0_i32, %c0_i32_0 : i32, i32
  }
  func.func @transform_3(%arg0: i32, %arg1: i32) -> (i32, i32) {
    %c0_i32 = arith.constant 0 : i32
    %c0_i32_0 = arith.constant 0 : i32
    return %arg0, %c0_i32 : i32, i32
  }
}

</mosaic_0001>

<bundles_post_ra>
// kernel: tpu_custom_call.1
= control target key start
LH: loop header
LB: loop body
LE: loop exit
PB: predicated region body
PF: predicated region fallthrough
CT: control target
= control target key end

     0   :  { %8 = vsyncpa [#allocation5], 0  ;;  %s1465_s0 = inlined_call_operand.hbm [shape: f32[8,256], index: 0, kind: input, shape index: {}]   ;;  %s1466_s1 = inlined_call_operand.hbm [shape: f32[256,128], index: 1, kind: input, shape index: {}]   ;;  %s1467_s2 = inlined_call_operand.vmem [shape: f32[1,128], index: 2, kind: input, shape index: {}]   ;;  %s1468_s3 = inlined_call_operand.hbm [shape: f32[8,128], index: 3, kind: output, shape index: {}]  }
   0x1   :  { %9 = vsyncpa [#allocation8], 0 }
   0x2   :  { %10 = vsyncpa [#allocation6], 0  ;;  %s16_s14 = sshll.u32 %s1465_s0, 4  ;;  %s915_s15 = smov [#allocation4]   ;;  %s17_s14 = int_to_ptr.hbm [resolvable:$true] %s16_s14 }
   0x3   :  { %s18_s16 = sshll.u32 %s915_s15, 4  ;;  %s26_s19 = sshll.u32 %s1466_s1, 4  ;;  %s19_s16 = int_to_ptr.vmem [resolvable:$true] %s18_s16  ;;  %s27_s19 = int_to_ptr.hbm [resolvable:$true] %s26_s19 }
   0x4   :  { %21 = dma.hbm_to_vmem [thread:$0]  %s17_s14, 256, %s19_s16, [#allocation5]  }
   0x5   :  { %s916_s20 = smov [#allocation7]   ;;  %s917_s22 = smov 128  }
   0x6   :  { %s28_s21 = sshll.u32 %s916_s20, 4  ;;  %s918_s23 = smov 8   ;;  %s29_s21 = int_to_ptr.vmem [resolvable:$true] %s28_s21 }
   0x7   :  { %34 = dma.hbm_to_vmem [thread:$0]  %s27_s19, 4096, %s29_s21, [#allocation8], %s917_s22, %s917_s22, %s918_s23  }
   0x8   :  { %909 = dma.done.wait [#allocation5], 256  }
   0x9   :  { %910 = vsyncadd [#allocation5], 4294967040 }
   0xa   :  { %911 = dma.done.wait [#allocation8], 4096  }
   0xb   :  { %912 = vsyncadd [#allocation8], 4294963200  ;;  %v948_v0 = vld [vmem:[#allocation4] sm:$0xff]  ;;  %v950_v1 = vld [vmem:[#allocation4 + $0x8] sm:$0xff]  ;;  %vm50_vm0 = vcmask 7168   ;;  %s921_s24 = smov [#allocation9]  }
   0xc   :  { %1499 = vst [vmem:[#allocation13_spill] sm:$0xff] %v950_v1  ;;  %v79_v2 = vld [vmem:[#allocation7 + $0x78] sm:$0xff]  ;;  %v55_v3 = vmul.f32 %v948_v0, %v948_v0  ;;  %v56_v4 = vmul.f32 %v950_v1, %v950_v1  ;;  %v78_v5 = vld [vmem:[#allocation7 + $0x70] sm:$0xff]  ;;  %v77_v6 = vld [vmem:[#allocation7 + $0x68] sm:$0xff]  ;;  %s813_s25 = sshll.u32 %s921_s24, 4  ;;  %s815_s28 = sshll.u32 %s1468_s3, 4  ;;  %s814_s25 = int_to_ptr.vmem [resolvable:$true] %s813_s25  ;;  %s816_s28 = int_to_ptr.hbm [resolvable:$true] %s815_s28 }
   0xd   :  { %v76_v7 = vld [vmem:[#allocation7 + $0x60] sm:$0xff]  ;;  %v956_v8 = vand.u32 4294901760, %v79_v2  ;;  %v958_v9 = vand.u32 4294901760, %v78_v5  ;;  %v960_v10 = vand.u32 4294901760, %v77_v6  ;;  %v75_v12 = vld [vmem:[#allocation7 + $0x58] sm:$0xff]  ;;  %v74_v13 = vld [vmem:[#allocation7 + $0x50] sm:$0xff] }
   0xe   :  { %v962_v11 = vand.u32 4294901760, %v76_v7  ;;  %v57_v14 = vadd.f32 %v56_v4, %v55_v3  ;;  %v964_v15 = vand.u32 4294901760, %v75_v12  ;;  %v966_v16 = vand.u32 4294901760, %v74_v13  ;;  %v73_v17 = vld [vmem:[#allocation7 + $0x48] sm:$0xff]  ;;  %v72_v18 = vld [vmem:[#allocation7 + $0x40] sm:$0xff]  ;;  %v71_v30 = vld [vmem:[#allocation7 + $0x38] sm:$0xff] }
   0xf   :  { %v969_v19 = vsub.f32 %v79_v2, %v956_v8  ;;  %97 = vmatpush.msra.mxu0 %v956_v8  ;;  %v973_v20 = vsub.f32 %v78_v5, %v958_v9  ;;  %293 = vmatpush.msra.mxu3 %v956_v8  ;;  %v977_v21 = vsub.f32 %v77_v6, %v960_v10  ;;  %v979_v22 = vand.u32 4294901760, %v73_v17  ;;  %v70_v39 = vld [vmem:[#allocation7 + $0x30] sm:$0xff]  ;;  %v69_v40 = vld [vmem:[#allocation7 + $0x28] sm:$0xff]  ;;  %v68_v45 = vld [vmem:[#allocation7 + $0x20] sm:$0xff] }
  0x10   :  { %58 = vadd.xlane.f32.xlu0 %v57_v14  ;;  %v982_v23 = vsub.f32 %v76_v7, %v962_v11  ;;  %v985_v24 = vsub.f32 %v75_v12, %v964_v15  ;;  %v988_v25 = vsub.f32 %v74_v13, %v966_v16  ;;  %v995_v29 = vand.u32 4294901760, %v72_v18  ;;  %v67_v53 = vld [vmem:[#allocation7 + $0x18] sm:$0xff]  ;;  %v66_v58 = vld [vmem:[#allocation7 + $0x10] sm:$0xff]  ;;  %v65_v2 = vld [vmem:[#allocation7 + $0x8] sm:$0xff] }
  0x11   :  { %240 = vmatpush.msra.mxu2 %v969_v19  ;;  %99 = vmatpush.msra.mxu0 %v958_v9  ;;  %v1483_v26 = vand.u32 4294901760, %v969_v19  ;;  %v1480_v27 = vand.u32 4294901760, %v973_v20  ;;  %v1479_v28 = vand.u32 4294901760, %v977_v21  ;;  %v1000_v32 = vsub.f32 %v73_v17, %v979_v22  ;;  %v95_v3 = vld [vmem:[#allocation7 + $0xf8] sm:$0xff]  ;;  %v94_v6 = vld [vmem:[#allocation7 + $0xf0] sm:$0xff]  ;;  %v64_v14 = vld [vmem:[#allocation7] sm:$0xff] }
  0x12   :  { %295 = vmatpush.msra.mxu3 %v958_v9  ;;  %v1477_v31 = vand.u32 4294901760, %v982_v23  ;;  %v1476_v36 = vand.u32 4294901760, %v985_v24  ;;  %v1475_v37 = vand.u32 4294901760, %v988_v25  ;;  %v1016_v38 = vand.u32 4294901760, %v71_v30 }
  0x13   :  { %243 = vmatpush.msra.mxu2 %v973_v20  ;;  %v140_v33 = vsub.f32 %v969_v19, %v1483_v26  ;;  %101 = vmatpush.msra.mxu0 %v960_v10  ;;  %v146_v34 = vsub.f32 %v973_v20, %v1480_v27  ;;  %v152_v35 = vsub.f32 %v977_v21, %v1479_v28  ;;  %v1474_v46 = vand.u32 4294901760, %v1000_v32  ;;  %v87_v27 = vld [vmem:[#allocation7 + $0xb8] sm:$0xff] }
  0x14   :  { %297 = vmatpush.msra.mxu3 %v960_v10  ;;  %v158_v43 = vsub.f32 %v982_v23, %v1477_v31  ;;  %v1024_v44 = vsub.f32 %v72_v18, %v995_v29  ;;  %v1029_v47 = vsub.f32 %v71_v30, %v1016_v38  ;;  %v164_v49 = vsub.f32 %v985_v24, %v1476_v36  ;;  %v88_v31 = vld [vmem:[#allocation7 + $0xc0] sm:$0xff] }
  0x15   :  { %v141_v41 = vand.u32 4294901760, %v140_v33  ;;  %246 = vmatpush.msra.mxu2 %v977_v21  ;;  %v147_v42 = vand.u32 4294901760, %v146_v34  ;;  %103 = vmatpush.msra.mxu0 %v962_v11  ;;  %v153_v48 = vand.u32 4294901760, %v152_v35  ;;  %v1035_v50 = vand.u32 4294901760, %v70_v39  ;;  %v93_v33 = vld [vmem:[#allocation7 + $0xe8] sm:$0xff] }
  0x16   :  { %299 = vmatpush.msra.mxu3 %v962_v11  ;;  %v1037_v51 = vand.u32 4294901760, %v69_v40  ;;  %v1041_v52 = vand.u32 4294901760, %v68_v45  ;;  %v159_v54 = vand.u32 4294901760, %v158_v43  ;;  %v170_v55 = vsub.f32 %v988_v25, %v1475_v37 }
  0x17   :  { %142 = vmatpush.msra.mxu1 %v141_v41  ;;  %249 = vmatpush.msra.mxu2 %v982_v23  ;;  %v1472_v56 = vand.u32 4294901760, %v1024_v44  ;;  %v1049_v57 = vsub.f32 %v70_v39, %v1035_v50  ;;  %v1471_v59 = vand.u32 4294901760, %v1029_v47  ;;  %v165_v60 = vand.u32 4294901760, %v164_v49 }
  0x18   :  { %105 = vmatpush.msra.mxu0 %v964_v15  ;;  %301 = vmatpush.msra.mxu3 %v964_v15  ;;  %v176_v61 = vsub.f32 %v1000_v32, %v1474_v46  ;;  %v1059_v62 = vsub.f32 %v69_v40, %v1037_v51  ;;  %v1061_v63 = vand.u32 4294901760, %v67_v53  ;;  %v1066_v4 = vsub.f32 %v68_v45, %v1041_v52  ;;  %v92_v45 = vld [vmem:[#allocation7 + $0xe0] sm:$0xff] }
  0x19   :  { %148 = vmatpush.msra.mxu1 %v147_v42  ;;  %252 = vmatpush.msra.mxu2 %v985_v24  ;;  %v1068_v5 = vand.u32 4294901760, %v66_v58  ;;  %v171_v7 = vand.u32 4294901760, %v170_v55  ;;  %v182_v12 = vsub.f32 %v1024_v44, %v1472_v56  ;;  %v1470_v13 = vand.u32 4294901760, %v1049_v57 }
  0x1a   :  { %107 = vmatpush.msra.mxu0 %v966_v16  ;;  %303 = vmatpush.msra.mxu3 %v966_v16  ;;  %v188_v17 = vsub.f32 %v1029_v47, %v1471_v59  ;;  %v1080_v18 = vand.u32 4294901760, %v65_v2  ;;  %v1082_v30 = vand.u32 4294901760, %v95_v3  ;;  %v177_v34 = vand.u32 4294901760, %v176_v61 }
  0x1b   :  { %154 = vmatpush.msra.mxu1 %v153_v48  ;;  %255 = vmatpush.msra.mxu2 %v988_v25  ;;  %v1469_v35 = vand.u32 4294901760, %v1059_v62  ;;  %v1087_v39 = vsub.f32 %v67_v53, %v1061_v63  ;;  %v1089_v40 = vand.u32 4294901760, %v94_v6  ;;  %v1473_v41 = vand.u32 4294901760, %v1066_v4 }
  0x1c   :  { %109 = vmatpush.msra.mxu0 %v979_v22  ;;  %305 = vmatpush.msra.mxu3 %v979_v22  ;;  %1500 = vst [vmem:[#allocation14_spill] sm:$0xff] %v1080_v18  ;;  %v1095_v42 = vsub.f32 %v66_v58, %v1068_v5  ;;  %v1097_v43 = vand.u32 4294901760, %v64_v14  ;;  %v183_v48 = vand.u32 4294901760, %v182_v12  ;;  %v194_v49 = vsub.f32 %v1049_v57, %v1470_v13 }
  0x1d   :  { %160 = vmatpush.msra.mxu1 %v159_v54  ;;  %258 = vmatpush.msra.mxu2 %v1000_v32  ;;  %v1104_v53 = vsub.f32 %v95_v3, %v1082_v30  ;;  %v1106_v54 = vand.u32 4294901760, %v93_v33  ;;  %v189_v55 = vand.u32 4294901760, %v188_v17  ;;  %v1111_v58 = vsub.f32 %v65_v2, %v1080_v18  ;;  %v90_v17 = vld [vmem:[#allocation7 + $0xd0] sm:$0xff] }
  0x1e   :  { %111 = vmatpush.msra.mxu0 %v995_v29  ;;  %307 = vmatpush.msra.mxu3 %v995_v29  ;;  %1501 = vst [vmem:[#allocation15_spill] sm:$0xff] %v1097_v43  ;;  %v200_v61 = vsub.f32 %v1059_v62, %v1469_v35  ;;  %v1478_v3 = vand.u32 4294901760, %v1087_v39  ;;  %v1121_v12 = vand.u32 4294901760, %v92_v45  ;;  %v206_v2 = vsub.f32 %v1066_v4, %v1473_v41 }
  0x1f   :  { %166 = vmatpush.msra.mxu1 %v165_v60  ;;  %261 = vmatpush.msra.mxu2 %v1024_v44  ;;  %1502 = vst [vmem:[#allocation16_spill] sm:$0xff] %v1104_v53  ;;  %v91_v60 = vld [vmem:[#allocation7 + $0xd8] sm:$0xff]  ;;  %v1130_v35 = vsub.f32 %v64_v14, %v1097_v43  ;;  %v1482_v13 = vand.u32 4294901760, %v1104_v53  ;;  %v1135_v59 = vsub.f32 %v93_v33, %v1106_v54  ;;  %v1484_v41 = vand.u32 4294901760, %v1111_v58  ;;  %v89_v14 = vld [vmem:[#allocation7 + $0xc8] sm:$0xff] }
  0x20   :  { %113 = vmatpush.msra.mxu0 %v1016_v38  ;;  %309 = vmatpush.msra.mxu3 %v1016_v38  ;;  %v1137_v56 = vand.u32 4294901760, %v91_v60  ;;  %v1142_v46 = vand.u32 4294901760, %v90_v17  ;;  %v212_v33 = vsub.f32 %v1087_v39, %v1478_v3  ;;  %v1150_v37 = vsub.f32 %v92_v45, %v1121_v12 }
  0x21   :  { %172 = vmatpush.msra.mxu1 %v171_v7  ;;  %264 = vmatpush.msra.mxu2 %v1029_v47  ;;  %v1119_v7 = vsub.f32 %v94_v6, %v1089_v40  ;;  %v195_v6 = vand.u32 4294901760, %v194_v49  ;;  %1504 = vst [vmem:[#allocation18_spill] sm:$0xff] %v1135_v59  ;;  %v207_v36 = vand.u32 4294901760, %v206_v2  ;;  %v481_v45 = vsub.f32 %v1104_v53, %v1482_v13 }
  0x22   :  { %115 = vmatpush.msra.mxu0 %v1035_v50  ;;  %311 = vmatpush.msra.mxu3 %v1035_v50  ;;  %1505 = vst [vmem:[#allocation19_spill] sm:$0xff] %v1150_v37  ;;  %v1164_v2 = vsub.f32 %v91_v60, %v1137_v56  ;;  %v1166_v28 = vand.u32 4294901760, %v89_v14  ;;  %v213_v13 = vand.u32 4294901760, %v212_v33  ;;  %v1181_v3 = vand.u32 4294901760, %v88_v31  ;;  %v86_v33 = vld [vmem:[#allocation7 + $0xb0] sm:$0xff] }
  0x23   :  { %178 = vmatpush.msra.mxu1 %v177_v34  ;;  %267 = vmatpush.msra.mxu2 %v1049_v57  ;;  %1503 = vst [vmem:[#allocation17_spill] sm:$0xff] %v1119_v7  ;;  %v1481_v34 = vand.u32 4294901760, %v1095_v42  ;;  %v1485_v49 = vand.u32 4294901760, %v1119_v7  ;;  %v1507_v26 = vand.u32 4294901760, %v1135_v59  ;;  %v1508_v53 = vand.u32 4294901760, %v1150_v37 }
  0x24   :  { %117 = vmatpush.msra.mxu0 %v1037_v51  ;;  %313 = vmatpush.msra.mxu3 %v1037_v51 }
  0x25   :  { %184 = vmatpush.msra.mxu1 %v183_v48  ;;  %270 = vmatpush.msra.mxu2 %v1059_v62  ;;  %v201_v48 = vand.u32 4294901760, %v200_v61  ;;  %v487_v60 = vsub.f32 %v1119_v7, %v1485_v49  ;;  %v482_v49 = vand.u32 4294901760, %v481_v45  ;;  %v493_v1 = vsub.f32 %v1135_v59, %v1507_v26  ;;  %v84_v59 = vld [vmem:[#allocation7 + $0xa0] sm:$0xff] }
  0x26   :  { %119 = vmatpush.msra.mxu0 %v1041_v52  ;;  %315 = vmatpush.msra.mxu3 %v1041_v52  ;;  %v499_v26 = vsub.f32 %v1150_v37, %v1508_v53  ;;  %v1206_v7 = vsub.f32 %v88_v31, %v1181_v3  ;;  %v1510_v53 = vand.u32 4294901760, %v1164_v2  ;;  %v82_v37 = vld [vmem:[#allocation7 + $0x90] sm:$0xff] }
  0x27   :  { %190 = vmatpush.msra.mxu1 %v189_v55  ;;  %273 = vmatpush.msra.mxu2 %v1066_v4  ;;  %v218_v55 = vsub.f32 %v1095_v42, %v1481_v34  ;;  %v1174_v34 = vsub.f32 %v90_v17, %v1142_v46  ;;  %v1506_v17 = vand.u32 4294901760, %v1130_v35  ;;  %v488_v45 = vand.u32 4294901760, %v487_v60 }
  0x28   :  { %121 = vmatpush.msra.mxu0 %v1061_v63  ;;  %317 = vmatpush.msra.mxu3 %v1061_v63  ;;  %v494_v60 = vand.u32 4294901760, %v493_v1  ;;  %v505_v31 = vsub.f32 %v1164_v2, %v1510_v53  ;;  %v500_v1 = vand.u32 4294901760, %v499_v26  ;;  %v1232_v53 = vand.u32 4294901760, %v84_v59 }
  0x29   :  { %196 = vmatpush.msra.mxu1 %v195_v6  ;;  %276 = vmatpush.msra.mxu2 %v1087_v39  ;;  %v224_v6 = vsub.f32 %v1111_v58, %v1484_v41  ;;  %v219_v61 = vand.u32 4294901760, %v218_v55  ;;  %v1188_v41 = vand.u32 4294901760, %v87_v27  ;;  %v1196_v55 = vsub.f32 %v89_v14, %v1166_v28 }
  0x2a   :  { %123 = vmatpush.msra.mxu0 %v1068_v5  ;;  %319 = vmatpush.msra.mxu3 %v1068_v5  ;;  %v1208_v14 = vand.u32 4294901760, %v86_v33 }
  0x2b   :  { %202 = vmatpush.msra.mxu1 %v201_v48  ;;  %279 = vmatpush.msra.mxu2 %v1095_v42  ;;  %v230_v48 = vsub.f32 %v1130_v35, %v1506_v17 }
  0x2c   :  { %125 = vmatpush.msra.mxu0 %v1080_v18  ;;  %321 = vmatpush.msra.mxu3 %v1080_v18  ;;  %v225_v18 = vand.u32 4294901760, %v224_v6  ;;  %v1509_v6 = vand.u32 4294901760, %v969_v19  ;;  %v1511_v19 = vand.u32 4294901760, %v973_v20  ;;  %v1513_v20 = vand.u32 4294901760, %v977_v21 }
  0x2d   :  { %208 = vmatpush.msra.mxu1 %v207_v36  ;;  %282 = vmatpush.msra.mxu2 %v1111_v58  ;;  %v85_v36 = vld [vmem:[#allocation7 + $0xa8] sm:$0xff]  ;;  %v231_v17 = vand.u32 4294901760, %v230_v48 }
  0x2e   :  { %127 = vmatpush.msra.mxu0 %v1097_v43  ;;  %323 = vmatpush.msra.mxu3 %v1097_v43  ;;  %v1220_v43 = vand.u32 4294901760, %v85_v36 }
  0x2f   :  { %214 = vmatpush.msra.mxu1 %v213_v13  ;;  %285 = vmatpush.msra.mxu2 %v1130_v35  ;;  %v1214_v13 = vsub.f32 %v87_v27, %v1188_v41  ;;  %v1512_v27 = vand.u32 4294901760, %v1174_v34 }
  0x30   :  { %334 = vmatpush.msrb.mxu0 %v1509_v6  ;;  %483 = vmatpush.msrb.mxu3 %v482_v49  ;;  %v1498_v49 = vand.u32 4294901760, %v1206_v7  ;;  %v1230_v6 = vsub.f32 %v86_v33, %v1208_v14  ;;  %v1242_v33 = vsub.f32 %v85_v36, %v1220_v43  ;;  %v1255_v36 = vsub.f32 %v84_v59, %v1232_v53 }
  0x31   :  { %438 = vmatpush.msrb.mxu2 %v1082_v30  ;;  %220 = vmatpush.msra.mxu1 %v219_v61  ;;  %v511_v48 = vsub.f32 %v1174_v34, %v1512_v27  ;;  %v83_v61 = vld [vmem:[#allocation7 + $0x98] sm:$0xff] }
  0x32   :  { %338 = vmatpush.msrb.mxu0 %v1511_v19  ;;  %489 = vmatpush.msrb.mxu3 %v488_v45  ;;  %v1514_v45 = vand.u32 4294901760, %v1196_v55  ;;  %v1244_v27 = vand.u32 4294901760, %v83_v61  ;;  %v1515_v19 = vand.u32 4294901760, %v982_v23 }
  0x33   :  { %440 = vmatpush.msrb.mxu2 %v1089_v40  ;;  %226 = vmatpush.msra.mxu1 %v225_v18  ;;  %v506_v18 = vand.u32 4294901760, %v505_v31  ;;  %v512_v21 = vand.u32 4294901760, %v511_v48  ;;  %v1257_v31 = vand.u32 4294901760, %v82_v37  ;;  %v1517_v48 = vand.u32 4294901760, %v985_v24 }
  0x34   :  { %342 = vmatpush.msrb.mxu0 %v1513_v20  ;;  %495 = vmatpush.msrb.mxu3 %v494_v60  ;;  %v517_v26 = vsub.f32 %v1196_v55, %v1514_v45  ;;  %v81_v20 = vld [vmem:[#allocation7 + $0x88] sm:$0xff]  ;;  %v534_v60 = vand.u32 4294901760, %v1230_v6  ;;  %v1268_v59 = vsub.f32 %v83_v61, %v1244_v27 }
  0x35   :  { %442 = vmatpush.msrb.mxu2 %v1106_v54  ;;  %232 = vmatpush.msra.mxu1 %v231_v17  ;;  %v523_v17 = vsub.f32 %v1206_v7, %v1498_v49  ;;  %v1270_v45 = vand.u32 4294901760, %v81_v20  ;;  %v1518_v49 = vand.u32 4294901760, %v988_v25  ;;  %v1281_v61 = vsub.f32 %v82_v37, %v1257_v31 }
  0x36   :  { %346 = vmatpush.msrb.mxu0 %v1515_v19  ;;  %501 = vmatpush.msrb.mxu3 %v500_v1  ;;  %v518_v1 = vand.u32 4294901760, %v517_v26  ;;  %v540_v19 = vand.u32 4294901760, %v1242_v33  ;;  %v546_v26 = vand.u32 4294901760, %v1255_v36  ;;  %v1519_v25 = vand.u32 4294901760, %v1000_v32 }
  0x37   :  { %401 = vmatpush.msrb.mxu1 %v956_v8  ;;  %444 = vmatpush.msrb.mxu2 %v1121_v12  ;;  %v1516_v8 = vand.u32 4294901760, %v1214_v13  ;;  %v524_v24 = vand.u32 4294901760, %v523_v17  ;;  %v1297_v17 = vsub.f32 %v81_v20, %v1270_v45  ;;  %v1521_v20 = vand.u32 4294901760, %v1029_v47 }
  0x38   :  { %350 = vmatpush.msrb.mxu0 %v1517_v48  ;;  %507 = vmatpush.msrb.mxu3 %v506_v18  ;;  %v535_v18 = vsub.f32 %v1230_v6, %v534_v60  ;;  %v558_v48 = vand.u32 4294901760, %v1281_v61 }
  0x39   :  { %403 = vmatpush.msrb.mxu1 %v958_v9  ;;  %446 = vmatpush.msrb.mxu2 %v1137_v56  ;;  %v529_v23 = vsub.f32 %v1214_v13, %v1516_v8  ;;  %v80_v9 = vld [vmem:[#allocation7 + $0x80] sm:$0xff]  ;;  %v1284_v8 = vand.u32 4294901760, %v948_v0 }
  0x3a   :  { %354 = vmatpush.msrb.mxu0 %v1518_v49  ;;  %513 = vmatpush.msrb.mxu3 %v512_v21  ;;  %v541_v49 = vsub.f32 %v1242_v33, %v540_v19  ;;  %v552_v21 = vand.u32 4294901760, %v1268_v59  ;;  %v1294_v37 = vand.u32 4294901760, %v80_v9  ;;  %v536_v32 = vand.u32 4294901760, %v535_v18 }
  0x3b   :  { %405 = vmatpush.msrb.mxu1 %v960_v10  ;;  %448 = vmatpush.msrb.mxu2 %v1142_v46  ;;  %v530_v10 = vand.u32 4294901760, %v529_v23  ;;  %v547_v23 = vsub.f32 %v1255_v36, %v546_v26  ;;  %v559_v47 = vsub.f32 %v1281_v61, %v558_v48 }
  0x3c   :  { %358 = vmatpush.msrb.mxu0 %v1519_v25  ;;  %519 = vmatpush.msrb.mxu3 %v518_v1  ;;  %v553_v1 = vsub.f32 %v1268_v59, %v552_v21  ;;  %v1318_v18 = vsub.f32 %v80_v9, %v1294_v37  ;;  %v1523_v9 = vand.u32 4294901760, %v1059_v62  ;;  %v1525_v62 = vand.u32 4294901760, %v1087_v39 }
  0x3d   :  { %407 = vmatpush.msrb.mxu1 %v962_v11  ;;  %450 = vmatpush.msrb.mxu2 %v1166_v28  ;;  %v1520_v11 = vand.u32 4294901760, %v1024_v44  ;;  %v542_v44 = vand.u32 4294901760, %v541_v49  ;;  %v560_v49 = vand.u32 4294901760, %v559_v47  ;;  %v919_v47 = vmov 0.0  }
  0x3e   :  { %525 = vmatpush.msrb.mxu3 %v524_v24  ;;  %v564_v24 = vand.u32 4294901760, %v1297_v17  ;;  %234 = vmatmul.f32.vlgmr.msra.gmra.mxu1 %v1284_v8  ;;  %51 = vst.msk [vmem:[#allocation3] sm:$0xff] %vm50_vm0, %v919_v47 }
  0x3f   :  { %409 = vmatpush.msrb.mxu1 %v964_v15  ;;  %452 = vmatpush.msrb.mxu2 %v1181_v3  ;;  %v129_v15 = vsub.f32 %v948_v0, %v1284_v8  ;;  %v1522_v0 = vand.u32 4294901760, %v1049_v57 }
  0x40   :  { %362 = vmatpush.msrb.mxu0 %v1520_v11  ;;  %531 = vmatpush.msrb.mxu3 %v530_v10  ;;  %v565_v57 = vsub.f32 %v1297_v17, %v564_v24  ;;  %v570_v10 = vand.u32 4294901760, %v1318_v18 }
  0x41   :  { %411 = vmatpush.msrb.mxu1 %v966_v16  ;;  %454 = vmatpush.msrb.mxu2 %v1188_v41  ;;  %v548_v16 = vand.u32 4294901760, %v547_v23  ;;  %v130_v25 = vand.u32 4294901760, %v129_v15 }
  0x42   :  { %366 = vmatpush.msrb.mxu0 %v1521_v20  ;;  %537 = vmatpush.msrb.mxu3 %v536_v32  ;;  %v566_v11 = vand.u32 4294901760, %v565_v57  ;;  %v1532_v20 = vld [vmem:[#allocation17_spill] sm:$0xff] }
  0x43   :  { %413 = vmatpush.msrb.mxu1 %v979_v22  ;;  %456 = vmatpush.msrb.mxu2 %v1208_v14  ;;  %v554_v22 = vand.u32 4294901760, %v553_v1  ;;  %v131_v32 = vsub.f32 %v129_v15, %v130_v25 }
  0x44   :  { %370 = vmatpush.msrb.mxu0 %v1522_v0  ;;  %543 = vmatpush.msrb.mxu3 %v542_v44  ;;  %v1538_v0 = vld [vmem:[#allocation19_spill] sm:$0xff] }
  0x45   :  { %415 = vmatpush.msrb.mxu1 %v995_v29  ;;  %458 = vmatpush.msrb.mxu2 %v1220_v43  ;;  %v1524_v29 = vand.u32 4294901760, %v1066_v4  ;;  %v1526_v4 = vand.u32 4294901760, %v1095_v42  ;;  %v132_v23 = vand.u32 4294901760, %v131_v32  ;;  %v1529_v42 = vld [vmem:[#allocation16_spill] sm:$0xff]  ;;  %v834_v32 = vld [vmem:[%s1467_s2] ss:$0 sm:$0xff] }
  0x46   :  { %374 = vmatpush.msrb.mxu0 %v1523_v9  ;;  %549 = vmatpush.msrb.mxu3 %v548_v16  ;;  %v1539_v16 = vand.u32 4294901760, %v1538_v0 }
  0x47   :  { %417 = vmatpush.msrb.mxu1 %v1016_v38  ;;  %460 = vmatpush.msrb.mxu2 %v1232_v53  ;;  %v571_v38 = vsub.f32 %v1318_v18, %v570_v10 }
  0x48   :  { %378 = vmatpush.msrb.mxu0 %v1524_v29  ;;  %555 = vmatpush.msrb.mxu3 %v554_v22 }
  0x49   :  { %419 = vmatpush.msrb.mxu1 %v1035_v50  ;;  %462 = vmatpush.msrb.mxu2 %v1244_v27  ;;  %v1527_v50 = vand.u32 4294901760, %v1111_v58  ;;  %v572_v39 = vand.u32 4294901760, %v571_v38  ;;  %v1531_v58 = vld [vmem:[#allocation14_spill] sm:$0xff] }
  0x4a   :  { %382 = vmatpush.msrb.mxu0 %v1525_v62  ;;  %561 = vmatpush.msrb.mxu3 %v560_v49 }
  0x4b   :  { %421 = vmatpush.msrb.mxu1 %v1037_v51  ;;  %464 = vmatpush.msrb.mxu2 %v1257_v31  ;;  %v1528_v51 = vand.u32 4294901760, %v1130_v35  ;;  %v1535_v35 = vld [vmem:[#allocation13_spill] sm:$0xff] }
  0x4c   :  { %386 = vmatpush.msrb.mxu0 %v1526_v4  ;;  %567 = vmatpush.msrb.mxu3 %v566_v11  ;;  %v1368_v44 = vand.u32 4294901760, %v1535_v35 }
  0x4d   :  { %423 = vmatpush.msrb.mxu1 %v1041_v52  ;;  %466 = vmatpush.msrb.mxu2 %v1270_v45  ;;  %v1530_v52 = vand.u32 4294901760, %v1529_v42 }
  0x4e   :  { %390 = vmatpush.msrb.mxu0 %v1527_v50  ;;  %288 = vmatmul.f32.vlgmr.msra.gmra.mxu2 %v129_v15  ;;  %v1534_v15 = vld [vmem:[#allocation15_spill] sm:$0xff]  ;;  %v1383_v9 = vsub.f32 %v1535_v35, %v1368_v44 }
  0x4f   :  { %425 = vmatpush.msrb.mxu1 %v1061_v63  ;;  %468 = vmatpush.msrb.mxu2 %v1294_v37  ;;  %v1533_v63 = vand.u32 4294901760, %v1532_v20 }
  0x50   :  { %394 = vmatpush.msrb.mxu0 %v1528_v51  ;;  %573 = vmatpush.msrb.mxu3 %v572_v39  ;;  %v471_v22 = vand.u32 4294901760, %v1383_v9 }
  0x51   :  { %427 = vmatpush.msrb.mxu1 %v1068_v5  ;;  %675 = vmatpush.msra.mxu2 %v1530_v52  ;;  %v1536_v5 = vld [vmem:[#allocation18_spill] sm:$0xff] }
  0x52   :  { %133 = vmatmul.f32.vlgmr.msra.gmra.mxu0 %v132_v23  ;;  %327 = vmatmul.f32.vlgmr.msra.gmra.mxu3 %v130_v25  ;;  %v1537_v1 = vand.u32 4294901760, %v1536_v5 }
  0x53   :  { %429 = vmatpush.msrb.mxu1 %v1531_v58  ;;  %581 = vmatpush.msra.mxu0 %v1529_v42 }
  0x54   :  { %679 = vmatpush.msra.mxu2 %v1533_v63  ;;  %742 = vmatpush.msra.mxu3 %v1082_v30 }
  0x55   :  { %431 = vmatpush.msrb.mxu1 %v1534_v15  ;;  %584 = vmatpush.msra.mxu0 %v1532_v20 }
  0x56   :  { %683 = vmatpush.msra.mxu2 %v1537_v1  ;;  %744 = vmatpush.msra.mxu3 %v1089_v40 }
  0x57   :  { %634 = vmatpush.msra.mxu1 %v1082_v30  ;;  %587 = vmatpush.msra.mxu0 %v1536_v5  ;;  %v1540_v30 = vand.u32 4294901760, %v1164_v2 }
  0x58   :  { %687 = vmatpush.msra.mxu2 %v1539_v16  ;;  %746 = vmatpush.msra.mxu3 %v1106_v54 }
  0x59   :  { %636 = vmatpush.msra.mxu1 %v1089_v40  ;;  %590 = vmatpush.msra.mxu0 %v1538_v0  ;;  %v1541_v40 = vand.u32 4294901760, %v1174_v34 }
  0x5a   :  { %691 = vmatpush.msra.mxu2 %v1540_v30  ;;  %748 = vmatpush.msra.mxu3 %v1121_v12 }
  0x5b   :  { %638 = vmatpush.msra.mxu1 %v1106_v54  ;;  %593 = vmatpush.msra.mxu0 %v1164_v2  ;;  %v1542_v54 = vand.u32 4294901760, %v1196_v55 }
  0x5c   :  { %695 = vmatpush.msra.mxu2 %v1541_v40  ;;  %750 = vmatpush.msra.mxu3 %v1137_v56 }
  0x5d   :  { %640 = vmatpush.msra.mxu1 %v1121_v12  ;;  %596 = vmatpush.msra.mxu0 %v1174_v34  ;;  %v1543_v12 = vand.u32 4294901760, %v1206_v7  ;;  %v472_v34 = vsub.f32 %v1383_v9, %v471_v22 }
  0x5e   :  { %699 = vmatpush.msra.mxu2 %v1542_v54  ;;  %752 = vmatpush.msra.mxu3 %v1142_v46 }
  0x5f   :  { %642 = vmatpush.msra.mxu1 %v1137_v56  ;;  %599 = vmatpush.msra.mxu0 %v1196_v55  ;;  %v1544_v56 = vand.u32 4294901760, %v1214_v13 }
  0x60   :  { %703 = vmatpush.msra.mxu2 %v1543_v12  ;;  %754 = vmatpush.msra.mxu3 %v1166_v28 }
  0x61   :  { %644 = vmatpush.msra.mxu1 %v1142_v46  ;;  %602 = vmatpush.msra.mxu0 %v1206_v7  ;;  %v473_v46 = vand.u32 4294901760, %v472_v34 }
  0x62   :  { %707 = vmatpush.msra.mxu2 %v1544_v56  ;;  %756 = vmatpush.msra.mxu3 %v1181_v3 }
  0x63   :  { %646 = vmatpush.msra.mxu1 %v1166_v28  ;;  %605 = vmatpush.msra.mxu0 %v1214_v13  ;;  %v920_v28 = vmov 0  }
  0x64   :  { %711 = vmatpush.msra.mxu2 %v534_v60  ;;  %758 = vmatpush.msra.mxu3 %v1188_v41 }
  0x65   :  { %648 = vmatpush.msra.mxu1 %v1181_v3  ;;  %608 = vmatpush.msra.mxu0 %v1230_v6 }
  0x66   :  { %715 = vmatpush.msra.mxu2 %v540_v19  ;;  %760 = vmatpush.msra.mxu3 %v1208_v14 }
  0x67   :  { %650 = vmatpush.msra.mxu1 %v1188_v41  ;;  %611 = vmatpush.msra.mxu0 %v1242_v33  ;;  %v54_v41 = vld [vmem:[#allocation3] sm:$0xff] }
  0x68   :  { %719 = vmatpush.msra.mxu2 %v546_v26  ;;  %762 = vmatpush.msra.mxu3 %v1220_v43 }
  0x69   :  { %652 = vmatpush.msra.mxu1 %v1208_v14  ;;  %474 = vmatmul.f32.vlgmr.msrb.gmra.mxu2 %v473_v46 }
  0x6a   :  { %614 = vmatpush.msra.mxu0 %v1255_v36  ;;  %723 = vmatpush.msra.mxu2 %v552_v21 }
  0x6b   :  { %654 = vmatpush.msra.mxu1 %v1220_v43  ;;  %764 = vmatpush.msra.mxu3 %v1232_v53 }
  0x6c   :  { %396 = vmatmul.f32.vlgmr.msrb.gmra.mxu0 %v1284_v8  ;;  %575 = vmatmul.f32.vlgmr.msrb.gmra.mxu3 %v1368_v44 }
  0x6d   :  { %617 = vmatpush.msra.mxu0 %v1268_v59  ;;  %656 = vmatpush.msra.mxu1 %v1232_v53 }
  0x6e   :  { %727 = vmatpush.msra.mxu2 %v558_v48  ;;  %766 = vmatpush.msra.mxu3 %v1244_v27 }
  0x6f   :  { %433 = vmatmul.f32.vlgmr.msrb.gmra.mxu1 %v1284_v8  ;;  %620 = vmatpush.msra.mxu0 %v1281_v61 }
  0x70   :  { %658 = vmatpush.msra.mxu1 %v1244_v27  ;;  %731 = vmatpush.msra.mxu2 %v564_v24 }
  0x71   :  { %768 = vmatpush.msra.mxu3 %v1257_v31  ;;  %623 = vmatpush.msra.mxu0 %v1297_v17 }
  0x72   :  { %660 = vmatpush.msra.mxu1 %v1257_v31  ;;  %735 = vmatpush.msra.mxu2 %v570_v10 }
  0x73   :  { %770 = vmatpush.msra.mxu3 %v1270_v45  ;;  %737 = vmatmul.f32.vlgmr.msra.gmra.mxu2 %v1368_v44 }
  0x74   :  { %626 = vmatpush.msra.mxu0 %v1318_v18  ;;  %662 = vmatpush.msra.mxu1 %v1270_v45 }
  0x75   :  { %772 = vmatpush.msra.mxu3 %v1294_v37  ;;  %629 = vmatmul.f32.vlgmr.msra.gmra.mxu0 %v1383_v9 }
  0x76   :  { %774 = vmatmul.f32.vlgmr.msra.gmra.mxu3 %v1368_v44  ;;  %664 = vmatpush.msra.mxu1 %v1294_v37 }
  0x77   :  { %668 = vmatmul.f32.vlgmr.msra.gmra.mxu1 %v471_v22  ;;  %833 = vset.pattern.permute.xlu0 %v920_v28 }
  0x83   :  { %v59_v43 = vpop.xlane.xlu0 %58 }
  0x84   :  { %v60_v3 = vadd.f32 %v59_v43, %v54_v41 }
  0x86   :  { %62 = vst.msk [vmem:[#allocation3] sm:$0xff] %vm50_vm0, %v60_v3 }
  0x8d   :  { %v783_v7 = vld [vmem:[#allocation3] sm:$0xff] }
  0x8e   :  { %v784_v2 = vmax.f32 %v783_v7, 1e-24 }
  0x90   :  { %835 = vrsqrt.f32 %v784_v2  ;;  %vm791_vm2 = vweird.f32 %v784_v2 }
  0x96   :  { %v836_v55 = vpop.eup %835 }
  0x97   :  { %v786_v14 = vmul.f32 %v836_v55, %v784_v2  ;;  %vm792_vm1 = vweird.f32 %v836_v55 }
  0x98   :  { %vm793_vm3 = vmor %vm791_vm2, %vm792_vm1 }
  0x99   :  { %v787_v13 = vmul.f32 %v836_v55, %v786_v14 }
  0x9b   :  { %v788_v6 = vmul.f32 0.5, %v787_v13 }
  0x9d   :  { %v789_v53 = vsub.f32 1.5, %v788_v6 }
  0x9f   :  { %v790_v33 = vmul.f32 %v836_v55, %v789_v53 }
  0xa1   :  { %v794_v27 = vsel %vm793_vm3, %v836_v55, %v790_v33 }
  0xa2   :  { %798 = vperm.xlu0 %833, %v794_v27  }
  0xbb   :  { %v235_v60 = vpop.f32.mrf.mxu1 }
  0xcf   :  { %v134_v36 = vpop.f32.mrf.mxu0 }
  0xd0   :  { %v236_v31 = vadd.f32 %v235_v60, %v134_v36 }
  0xd1   :  { %v289_v19 = vpop.f32.mrf.mxu2 }
  0xd2   :  { %v290_v59 = vadd.f32 %v289_v19, %v236_v31 }
  0xd5   :  { %v328_v45 = vpop.f32.mrf.mxu3 }
  0xd6   :  { %v329_v26 = vadd.f32 %v328_v45, %v290_v59 }
  0xe9   :  { %v397_v61 = vpop.f32.mrf.mxu0 }
  0xea   :  { %v398_v8 = vadd.f32 %v397_v61, %v329_v26 }
  0xec   :  { %v434_v21 = vpop.f32.mrf.mxu1  ;;  %v475_v17 = vpop.f32.mrf.mxu2 }
  0xed   :  { %v435_v37 = vadd.f32 %v434_v21, %v398_v8 }
  0xef   :  { %v476_v48 = vadd.f32 %v475_v17, %v435_v37  ;;  %v576_v24 = vpop.f32.mrf.mxu3 }
  0xf1   :  { %v577_v18 = vadd.f32 %v576_v24, %v476_v48 }
  0xf2   :  { %v630_v57 = vpop.f32.mrf.mxu0 }
  0xf3   :  { %v631_v10 = vadd.f32 %v630_v57, %v577_v18 }
  0xf4   :  { %v669_v25 = vpop.f32.mrf.mxu1 }
  0xf5   :  { %v670_v29 = vadd.f32 %v669_v25, %v631_v10 }
  0xf6   :  { %v738_v49 = vpop.f32.mrf.mxu2 }
  0xf7   :  { %v739_v62 = vadd.f32 %v738_v49, %v670_v29 }
  0xf9   :  { %v775_v11 = vpop.f32.mrf.mxu3 }
  0xfa   :  { %v776_v38 = vadd.f32 %v775_v11, %v739_v62 }
 0x114   :  { %v799_v4 = vpop.permute.xlu0 %798 }
 0x115   :  { %v801_v50 = vmul.f32 %v799_v4, %v776_v38 }
 0x117   :  { %v806_v39 = vadd.f32 %v834_v32, %v801_v50 }
 0x119   :  { %807 = vst [vmem:[#allocation9] sm:$0xff] %v806_v39 }
 0x11a   :  { %818 = dma.vmem_to_hbm [thread:$0]  %s814_s25, 128, %s816_s28, [#allocation6]  }
 0x11b   :  { %913 = dma.done.wait [#allocation6], 128  }
 0x11c   :  { %914 = vsyncadd [#allocation6], 4294967168 }
 0x11d   :  { %823 = vsyncpa [#allocation5], 1 }
 0x11e   :  { %824 = vsyncpa [#allocation8], 1 }
 0x11f   :  { %825 = vsyncpa [#allocation6], 1 }

</bundles_post_ra>
